<compile_context>
chip_gen: v7x
topology: tpu7x:2x2x1
jax: 0.10.0
libtpu: 0.0.40
codegen_flags: <defaults>
</compile_context>

<pallas_src>
import numpy as np
import jax
import jax.numpy as jnp
from jax.experimental import pallas as pl
from jax.experimental.pallas import tpu as pltpu


def _round_up(x, m):
    return ((x + m - 1) // m) * m


def _cdiv(a, b):
    return (a + b - 1) // b


# ---------------------------------------------------------------------------
# Kernel
# ---------------------------------------------------------------------------

def ppo_forward_kernel(g_ref, s_ref,
                       gw1_ref, gb1_ref, gw2_ref, gb2_ref,
                       sw1_ref, sb1_ref, sw2_ref, sb2_ref,
                       cwg_ref, cws_ref, cb_ref,
                       hw_ref, hb_ref,
                       out_ref):
    """Fused PPO MLP forward for one batch tile.

    Streamed inputs (per batch tile, f32, cast to bf16 in-kernel):
      g : flattened grid obs    [tile_b, grid_flat]
      s : flattened shapes obs  [tile_b, shapes_flat]
    VMEM-resident weights (bf16):
      gw1/gw2, sw1/sw2 : per-tower encoder layers      [*, H], [H, H]
      cwg, cws         : combined encoder, split rows  [H, H] each
      hw               : fused policy+value head, lane-padded [H, OUT_PAD]
    Biases stay f32 and are added to the f32 MXU accumulator.  Output is one
    lane-dense bf16 [tile_b, OUT_PAD] slab (sliced in the wrapper).
    """
    cdt = gw1_ref.dtype
    f32 = jnp.float32
    relu = lambda t: jnp.maximum(t, 0.0)

    g = g_ref[...].astype(cdt)   # f32 -> bf16 cast in-kernel (free VPU filler)
    s = s_ref[...].astype(cdt)

    # Grid tower.
    gh = relu(jnp.dot(g, gw1_ref[...], preferred_element_type=f32)
              + gb1_ref[...])
    gh = relu(jnp.dot(gh.astype(cdt), gw2_ref[...], preferred_element_type=f32)
              + gb2_ref[...])

    # Shapes tower.
    sh = relu(jnp.dot(s, sw1_ref[...], preferred_element_type=f32)
              + sb1_ref[...])
    sh = relu(jnp.dot(sh.astype(cdt), sw2_ref[...], preferred_element_type=f32)
              + sb2_ref[...])

    # Combined encoder on [gh | sh] as a split matmul (no lane concat).
    f = relu(jnp.dot(gh.astype(cdt), cwg_ref[...], preferred_element_type=f32)
             + jnp.dot(sh.astype(cdt), cws_ref[...], preferred_element_type=f32)
             + cb_ref[...])

    # Fused policy + value head -> lane-dense slab.
    out = jnp.dot(f.astype(cdt), hw_ref[...], preferred_element_type=f32) \
        + hb_ref[...]
    out_ref[...] = out.astype(out_ref.dtype)


# ---------------------------------------------------------------------------
# Parameter init (mimics torch.nn.Linear default init) and wrapper-side packing
# ---------------------------------------------------------------------------

def init_linear(key, in_dim, out_dim):
    kw, kb = jax.random.split(key)
    bound = 1.0 / np.sqrt(in_dim)
    w = jax.random.uniform(kw, (in_dim, out_dim), jnp.float32, -bound, bound)
    b = jax.random.uniform(kb, (1, out_dim), jnp.float32, -bound, bound)
    return w, b


def make_params(grid_flat, shapes_flat, hidden_dim, action_dim, seed=0):
    keys = jax.random.split(jax.random.PRNGKey(seed), 7)
    gw1, gb1 = init_linear(keys[0], grid_flat, hidden_dim)
    gw2, gb2 = init_linear(keys[1], hidden_dim, hidden_dim)
    sw1, sb1 = init_linear(keys[2], shapes_flat, hidden_dim)
    sw2, sb2 = init_linear(keys[3], hidden_dim, hidden_dim)
    cw, cb = init_linear(keys[4], hidden_dim * 2, hidden_dim)
    pw, pb = init_linear(keys[5], hidden_dim, action_dim)
    vw, vb = init_linear(keys[6], hidden_dim, 1)
    return (gw1, gb1, gw2, gb2, sw1, sb1, sw2, sb2, cw, cb, pw, pb, vw, vb)


def pack_params(params, compute_dtype=jnp.bfloat16):
    """Pack the 7 Linear layers into the kernel's operand layout (done once).

    Note: all weights are quantized to bf16 (f32 accumulation in-kernel).  If
    the critic turns out to be precision-sensitive, keep vw/hw in f32.
    """
    (gw1, gb1, gw2, gb2, sw1, sb1, sw2, sb2, cw, cb, pw, pb, vw, vb) = params
    grid_flat, H = gw1.shape
    shapes_flat = sw1.shape[0]
    action_dim = pw.shape[1]

    # Combined encoder split into the rows that multiply gh and sh.
    cwg = cw[:H, :]
    cws = cw[H:, :]

    # Fused policy + value head, padded to a 128-lane multiple.
    out_dim = action_dim + 1
    out_pad = _round_up(out_dim, 128)
    hw = jnp.zeros((H, out_pad), jnp.float32)
    hw = hw.at[:, :action_dim].set(pw).at[:, action_dim:out_dim].set(vw)
    hb = jnp.zeros((1, out_pad), jnp.float32)
    hb = hb.at[:, :action_dim].set(pb).at[:, action_dim:out_dim].set(vb)

    c = lambda w: w.astype(compute_dtype)
    packed = (c(gw1), gb1, c(gw2), gb2,
              c(sw1), sb1, c(sw2), sb2,
              c(cwg), c(cws), cb,
              c(hw), hb)
    meta = dict(action_dim=action_dim, grid_flat=grid_flat,
                shapes_flat=shapes_flat, out_pad=out_pad,
                compute_dtype=compute_dtype)
    return packed, meta


# ---------------------------------------------------------------------------
# Forward wrapper
# ---------------------------------------------------------------------------

def _choose_batch_tile(B, tile_b_max=4096, min_grid_steps=2):
    """Adaptive batch tile: waste < 16 rows/tile, >=2 grid steps when B allows
    (keeps both v7x TensorCores busy), 16-row sublane alignment for bf16."""
    n_tiles = max(1, _cdiv(B, tile_b_max))
    if B >= 32 * min_grid_steps:
        n_tiles = max(n_tiles, min_grid_steps)
    tile_b = _round_up(_cdiv(B, n_tiles), 16)
    b_pad = _round_up(B, tile_b)
    return tile_b, b_pad


def ppo_network_forward(obs_grid, obs_shapes, packed, meta, *, tile_b_max=4096):
    """obs_grid: [B, *grid_shape], obs_shapes: [B, *shapes_shape] (f32)."""
    B = obs_grid.shape[0]
    action_dim = meta["action_dim"]
    grid_flat = meta["grid_flat"]
    shapes_flat = meta["shapes_flat"]
    out_pad = meta["out_pad"]

    # Reshape only (free view) -- no concat/cast round trip through HBM.
    g = obs_grid.reshape(B, -1)
    s = obs_shapes.reshape(B, -1)

    tile_b, b_pad = _choose_batch_tile(B, tile_b_max=tile_b_max)
    if b_pad != B:
        g = jnp.pad(g, ((0, b_pad - B), (0, 0)))
        s = jnp.pad(s, ((0, b_pad - B), (0, 0)))

    (gw1, gb1, gw2, gb2, sw1, sb1, sw2, sb2,
     cwg, cws, cb, hw, hb) = packed

    const = lambda arr: pl.BlockSpec(arr.shape, lambda i: (0, 0))

    out = pl.pallas_call(
        ppo_forward_kernel,
        out_shape=jax.ShapeDtypeStruct((b_pad, out_pad), jnp.bfloat16),
        grid=(b_pad // tile_b,),
        in_specs=[
            pl.BlockSpec((tile_b, grid_flat), lambda i: (i, 0)),    # streamed g
            pl.BlockSpec((tile_b, shapes_flat), lambda i: (i, 0)),  # streamed s
            const(gw1), const(gb1), const(gw2), const(gb2),         # resident
            const(sw1), const(sb1), const(sw2), const(sb2),
            const(cwg), const(cws), const(cb),
            const(hw), const(hb),
        ],
        out_specs=pl.BlockSpec((tile_b, out_pad), lambda i: (i, 0)),
        compiler_params=pltpu.CompilerParams(
            dimension_semantics=("parallel",)),
    )(g, s, gw1, gb1, gw2, gb2, sw1, sb1, sw2, sb2, cwg, cws, cb, hw, hb)

    # Single fused slice+cast over the slab, then split logits / value.
    head = out[:B, :action_dim + 1].astype(jnp.float32)
    logits = head[:, :action_dim]
    value = head[:, action_dim:action_dim + 1]
    return logits, value


def reference_forward(obs_grid, obs_shapes, params):
    """Pure-JAX f32 reference matching the PyTorch module exactly."""
    (gw1, gb1, gw2, gb2, sw1, sb1, sw2, sb2, cw, cb, pw, pb, vw, vb) = params
    B = obs_grid.shape[0]
    g = obs_grid.reshape(B, -1).astype(jnp.float32)
    s = obs_shapes.reshape(B, -1).astype(jnp.float32)
    relu = lambda t: jnp.maximum(t, 0.0)
    gh = relu(relu(g @ gw1 + gb1) @ gw2 + gb2)
    sh = relu(relu(s @ sw1 + sb1) @ sw2 + sb2)
    comb = relu(jnp.concatenate([gh, sh], axis=1) @ cw + cb)
    return comb @ pw + pb, comb @ vw + vb


if __name__ == "__main__":
    # Small shapes consistent with the module:
    #   obs_shape = {'grid': (8, 8), 'shapes': (2, 4, 4)}, action_shape = (8, 8)
    B = 2
    grid_shape = (8, 8)        # grid_flat = 64
    shapes_shape = (2, 4, 4)   # shapes_flat = 32
    hidden_dim = 32
    action_dim = int(np.prod((8, 8)))  # 64

    grid_flat = int(np.prod(grid_shape))
    shapes_flat = int(np.prod(shapes_shape))

    key = jax.random.PRNGKey(0)
    k1, k2 = jax.random.split(key)
    obs_grid = jax.random.normal(k1, (B,) + grid_shape, jnp.float32)
    obs_shapes = jax.random.normal(k2, (B,) + shapes_shape, jnp.float32)

    params = make_params(grid_flat, shapes_flat, hidden_dim, action_dim, seed=0)
    packed, meta = pack_params(params, compute_dtype=jnp.bfloat16)

    logits, value = ppo_network_forward(obs_grid, obs_shapes, packed, meta)
    jax.block_until_ready((logits, value))

    ref_logits, ref_value = reference_forward(obs_grid, obs_shapes, params)
    # bf16 MXU inputs + bf16 output slab with f32 accumulation -> relaxed
    # tolerance vs the f32 reference.
    np.testing.assert_allclose(np.asarray(logits), np.asarray(ref_logits),
                               rtol=5e-2, atol=5e-2)
    np.testing.assert_allclose(np.asarray(value), np.asarray(ref_value),
                               rtol=5e-2, atol=5e-2)

    assert logits.shape == (B, action_dim) and value.shape == (B, 1)
    print("KERNEL_OK")
</pallas_src>

<mosaic_0001>
module attributes {stable_mosaic.version = 11 : i64} {
  func.func @ppo_forward_kernel(%arg0: i32, %arg1: memref<16x64xf32, #tpu.memory_space<vmem>>, %arg2: memref<16x32xf32, #tpu.memory_space<vmem>>, %arg3: memref<64x32xbf16, #tpu.memory_space<vmem>>, %arg4: memref<1x32xf32, #tpu.memory_space<vmem>>, %arg5: memref<32x32xbf16, #tpu.memory_space<vmem>>, %arg6: memref<1x32xf32, #tpu.memory_space<vmem>>, %arg7: memref<32x32xbf16, #tpu.memory_space<vmem>>, %arg8: memref<1x32xf32, #tpu.memory_space<vmem>>, %arg9: memref<32x32xbf16, #tpu.memory_space<vmem>>, %arg10: memref<1x32xf32, #tpu.memory_space<vmem>>, %arg11: memref<32x32xbf16, #tpu.memory_space<vmem>>, %arg12: memref<32x32xbf16, #tpu.memory_space<vmem>>, %arg13: memref<1x32xf32, #tpu.memory_space<vmem>>, %arg14: memref<32x128xbf16, #tpu.memory_space<vmem>>, %arg15: memref<1x128xf32, #tpu.memory_space<vmem>>, %arg16: memref<16x128xbf16, #tpu.memory_space<vmem>>) attributes {dimension_semantics = [#tpu.dimension_semantics<parallel>], iteration_bounds = array<i64: 1>, scalar_prefetch = 0 : i64, scratch_operands = 0 : i64, tpu.core_type = #tpu.core_type<tc>, window_params = [{transform_indices = @transform_0, window_bounds = array<i64: 16, 64>}, {transform_indices = @transform_1, window_bounds = array<i64: 16, 32>}, {pipeline_mode = #tpu.pipeline_mode<synchronous>, transform_indices = @transform_2, window_bounds = array<i64: 64, 32>}, {pipeline_mode = #tpu.pipeline_mode<synchronous>, transform_indices = @transform_3, window_bounds = array<i64: 1, 32>}, {pipeline_mode = #tpu.pipeline_mode<synchronous>, transform_indices = @transform_4, window_bounds = array<i64: 32, 32>}, {pipeline_mode = #tpu.pipeline_mode<synchronous>, transform_indices = @transform_5, window_bounds = array<i64: 1, 32>}, {pipeline_mode = #tpu.pipeline_mode<synchronous>, transform_indices = @transform_6, window_bounds = array<i64: 32, 32>}, {pipeline_mode = #tpu.pipeline_mode<synchronous>, transform_indices = @transform_7, window_bounds = array<i64: 1, 32>}, {pipeline_mode = #tpu.pipeline_mode<synchronous>, transform_indices = @transform_8, window_bounds = array<i64: 32, 32>}, {pipeline_mode = #tpu.pipeline_mode<synchronous>, transform_indices = @transform_9, window_bounds = array<i64: 1, 32>}, {pipeline_mode = #tpu.pipeline_mode<synchronous>, transform_indices = @transform_10, window_bounds = array<i64: 32, 32>}, {pipeline_mode = #tpu.pipeline_mode<synchronous>, transform_indices = @transform_11, window_bounds = array<i64: 32, 32>}, {pipeline_mode = #tpu.pipeline_mode<synchronous>, transform_indices = @transform_12, window_bounds = array<i64: 1, 32>}, {pipeline_mode = #tpu.pipeline_mode<synchronous>, transform_indices = @transform_13, window_bounds = array<i64: 32, 128>}, {pipeline_mode = #tpu.pipeline_mode<synchronous>, transform_indices = @transform_14, window_bounds = array<i64: 1, 128>}, {transform_indices = @transform_15, window_bounds = array<i64: 16, 128>}]} {
    %c0 = arith.constant 0 : index
    %c0_0 = arith.constant 0 : index
    %0 = vector.load %arg1[%c0, %c0_0] : memref<16x64xf32, #tpu.memory_space<vmem>>, vector<16x64xf32>
    %1 = arith.truncf %0 : vector<16x64xf32> to vector<16x64xbf16>
    %c0_1 = arith.constant 0 : index
    %c0_2 = arith.constant 0 : index
    %2 = vector.load %arg2[%c0_1, %c0_2] : memref<16x32xf32, #tpu.memory_space<vmem>>, vector<16x32xf32>
    %3 = arith.truncf %2 : vector<16x32xf32> to vector<16x32xbf16>
    %c0_3 = arith.constant 0 : index
    %c0_4 = arith.constant 0 : index
    %4 = vector.load %arg3[%c0_3, %c0_4] : memref<64x32xbf16, #tpu.memory_space<vmem>>, vector<64x32xbf16>
    %cst = arith.constant dense<0.000000e+00> : vector<16x32xf32>
    %5 = tpu.matmul %1, %4, %cst {dimension_numbers = #tpu.dot_dimension_numbers<[1], [0], [0], [1], [0, 0, 1, 1], [], []>} : vector<16x64xbf16>, vector<64x32xbf16>, vector<16x32xf32> -> vector<16x32xf32>
    %c0_5 = arith.constant 0 : index
    %c0_6 = arith.constant 0 : index
    %6 = vector.load %arg4[%c0_5, %c0_6] : memref<1x32xf32, #tpu.memory_space<vmem>>, vector<1x32xf32>
    %7 = vector.broadcast %6 : vector<1x32xf32> to vector<16x32xf32>
    %8 = arith.addf %5, %7 : vector<16x32xf32>
    %cst_7 = arith.constant 0.000000e+00 : f32
    %9 = vector.broadcast %cst_7 : f32 to vector<16x32xf32>
    %10 = arith.maximumf %8, %9 : vector<16x32xf32>
    %11 = arith.truncf %10 : vector<16x32xf32> to vector<16x32xbf16>
    %c0_8 = arith.constant 0 : index
    %c0_9 = arith.constant 0 : index
    %12 = vector.load %arg5[%c0_8, %c0_9] : memref<32x32xbf16, #tpu.memory_space<vmem>>, vector<32x32xbf16>
    %cst_10 = arith.constant dense<0.000000e+00> : vector<16x32xf32>
    %13 = tpu.matmul %11, %12, %cst_10 {dimension_numbers = #tpu.dot_dimension_numbers<[1], [0], [0], [1], [0, 0, 1, 1], [], []>} : vector<16x32xbf16>, vector<32x32xbf16>, vector<16x32xf32> -> vector<16x32xf32>
    %c0_11 = arith.constant 0 : index
    %c0_12 = arith.constant 0 : index
    %14 = vector.load %arg6[%c0_11, %c0_12] : memref<1x32xf32, #tpu.memory_space<vmem>>, vector<1x32xf32>
    %15 = vector.broadcast %14 : vector<1x32xf32> to vector<16x32xf32>
    %16 = arith.addf %13, %15 : vector<16x32xf32>
    %cst_13 = arith.constant 0.000000e+00 : f32
    %17 = vector.broadcast %cst_13 : f32 to vector<16x32xf32>
    %18 = arith.maximumf %16, %17 : vector<16x32xf32>
    %c0_14 = arith.constant 0 : index
    %c0_15 = arith.constant 0 : index
    %19 = vector.load %arg7[%c0_14, %c0_15] : memref<32x32xbf16, #tpu.memory_space<vmem>>, vector<32x32xbf16>
    %cst_16 = arith.constant dense<0.000000e+00> : vector<16x32xf32>
    %20 = tpu.matmul %3, %19, %cst_16 {dimension_numbers = #tpu.dot_dimension_numbers<[1], [0], [0], [1], [0, 0, 1, 1], [], []>} : vector<16x32xbf16>, vector<32x32xbf16>, vector<16x32xf32> -> vector<16x32xf32>
    %c0_17 = arith.constant 0 : index
    %c0_18 = arith.constant 0 : index
    %21 = vector.load %arg8[%c0_17, %c0_18] : memref<1x32xf32, #tpu.memory_space<vmem>>, vector<1x32xf32>
    %22 = vector.broadcast %21 : vector<1x32xf32> to vector<16x32xf32>
    %23 = arith.addf %20, %22 : vector<16x32xf32>
    %cst_19 = arith.constant 0.000000e+00 : f32
    %24 = vector.broadcast %cst_19 : f32 to vector<16x32xf32>
    %25 = arith.maximumf %23, %24 : vector<16x32xf32>
    %26 = arith.truncf %25 : vector<16x32xf32> to vector<16x32xbf16>
    %c0_20 = arith.constant 0 : index
    %c0_21 = arith.constant 0 : index
    %27 = vector.load %arg9[%c0_20, %c0_21] : memref<32x32xbf16, #tpu.memory_space<vmem>>, vector<32x32xbf16>
    %cst_22 = arith.constant dense<0.000000e+00> : vector<16x32xf32>
    %28 = tpu.matmul %26, %27, %cst_22 {dimension_numbers = #tpu.dot_dimension_numbers<[1], [0], [0], [1], [0, 0, 1, 1], [], []>} : vector<16x32xbf16>, vector<32x32xbf16>, vector<16x32xf32> -> vector<16x32xf32>
    %c0_23 = arith.constant 0 : index
    %c0_24 = arith.constant 0 : index
    %29 = vector.load %arg10[%c0_23, %c0_24] : memref<1x32xf32, #tpu.memory_space<vmem>>, vector<1x32xf32>
    %30 = vector.broadcast %29 : vector<1x32xf32> to vector<16x32xf32>
    %31 = arith.addf %28, %30 : vector<16x32xf32>
    %cst_25 = arith.constant 0.000000e+00 : f32
    %32 = vector.broadcast %cst_25 : f32 to vector<16x32xf32>
    %33 = arith.maximumf %31, %32 : vector<16x32xf32>
    %34 = arith.truncf %18 : vector<16x32xf32> to vector<16x32xbf16>
    %c0_26 = arith.constant 0 : index
    %c0_27 = arith.constant 0 : index
    %35 = vector.load %arg11[%c0_26, %c0_27] : memref<32x32xbf16, #tpu.memory_space<vmem>>, vector<32x32xbf16>
    %cst_28 = arith.constant dense<0.000000e+00> : vector<16x32xf32>
    %36 = tpu.matmul %34, %35, %cst_28 {dimension_numbers = #tpu.dot_dimension_numbers<[1], [0], [0], [1], [0, 0, 1, 1], [], []>} : vector<16x32xbf16>, vector<32x32xbf16>, vector<16x32xf32> -> vector<16x32xf32>
    %37 = arith.truncf %33 : vector<16x32xf32> to vector<16x32xbf16>
    %c0_29 = arith.constant 0 : index
    %c0_30 = arith.constant 0 : index
    %38 = vector.load %arg12[%c0_29, %c0_30] : memref<32x32xbf16, #tpu.memory_space<vmem>>, vector<32x32xbf16>
    %cst_31 = arith.constant dense<0.000000e+00> : vector<16x32xf32>
    %39 = tpu.matmul %37, %38, %cst_31 {dimension_numbers = #tpu.dot_dimension_numbers<[1], [0], [0], [1], [0, 0, 1, 1], [], []>} : vector<16x32xbf16>, vector<32x32xbf16>, vector<16x32xf32> -> vector<16x32xf32>
    %40 = arith.addf %36, %39 : vector<16x32xf32>
    %c0_32 = arith.constant 0 : index
    %c0_33 = arith.constant 0 : index
    %41 = vector.load %arg13[%c0_32, %c0_33] : memref<1x32xf32, #tpu.memory_space<vmem>>, vector<1x32xf32>
    %42 = vector.broadcast %41 : vector<1x32xf32> to vector<16x32xf32>
    %43 = arith.addf %40, %42 : vector<16x32xf32>
    %cst_34 = arith.constant 0.000000e+00 : f32
    %44 = vector.broadcast %cst_34 : f32 to vector<16x32xf32>
    %45 = arith.maximumf %43, %44 : vector<16x32xf32>
    %46 = arith.truncf %45 : vector<16x32xf32> to vector<16x32xbf16>
    %c0_35 = arith.constant 0 : index
    %c0_36 = arith.constant 0 : index
    %47 = vector.load %arg14[%c0_35, %c0_36] : memref<32x128xbf16, #tpu.memory_space<vmem>>, vector<32x128xbf16>
    %cst_37 = arith.constant dense<0.000000e+00> : vector<16x128xf32>
    %48 = tpu.matmul %46, %47, %cst_37 {dimension_numbers = #tpu.dot_dimension_numbers<[1], [0], [0], [1], [0, 0, 1, 1], [], []>} : vector<16x32xbf16>, vector<32x128xbf16>, vector<16x128xf32> -> vector<16x128xf32>
    %c0_38 = arith.constant 0 : index
    %c0_39 = arith.constant 0 : index
    %49 = vector.load %arg15[%c0_38, %c0_39] : memref<1x128xf32, #tpu.memory_space<vmem>>, vector<1x128xf32>
    %50 = vector.broadcast %49 : vector<1x128xf32> to vector<16x128xf32>
    %51 = arith.addf %48, %50 : vector<16x128xf32>
    %52 = arith.truncf %51 : vector<16x128xf32> to vector<16x128xbf16>
    %c0_40 = arith.constant 0 : index
    %c0_41 = arith.constant 0 : index
    %53 = vector.load %arg16[%c0_40, %c0_41] : memref<16x128xbf16, #tpu.memory_space<vmem>>, vector<16x128xbf16>
    tpu.vector_store %arg16[%c0_40, %c0_41], %52 {strides = array<i32>} : memref<16x128xbf16, #tpu.memory_space<vmem>>, vector<16x128xbf16>,
    return
  }
  func.func @transform_0(%arg0: i32) -> (i32, i32) {
    %c0_i32 = arith.constant 0 : i32
    %c0_i32_0 = arith.constant 0 : i32
    return %arg0, %c0_i32 : i32, i32
  }
  func.func @transform_1(%arg0: i32) -> (i32, i32) {
    %c0_i32 = arith.constant 0 : i32
    %c0_i32_0 = arith.constant 0 : i32
    return %arg0, %c0_i32 : i32, i32
  }
  func.func @transform_2(%arg0: i32) -> (i32, i32) {
    %c0_i32 = arith.constant 0 : i32
    %c0_i32_0 = arith.constant 0 : i32
    %c0_i32_1 = arith.constant 0 : i32
    return %c0_i32, %c0_i32_0 : i32, i32
  }
  func.func @transform_3(%arg0: i32) -> (i32, i32) {
    %c0_i32 = arith.constant 0 : i32
    %c0_i32_0 = arith.constant 0 : i32
    %c0_i32_1 = arith.constant 0 : i32
    return %c0_i32, %c0_i32_0 : i32, i32
  }
  func.func @transform_4(%arg0: i32) -> (i32, i32) {
    %c0_i32 = arith.constant 0 : i32
    %c0_i32_0 = arith.constant 0 : i32
    %c0_i32_1 = arith.constant 0 : i32
    return %c0_i32, %c0_i32_0 : i32, i32
  }
  func.func @transform_5(%arg0: i32) -> (i32, i32) {
    %c0_i32 = arith.constant 0 : i32
    %c0_i32_0 = arith.constant 0 : i32
    %c0_i32_1 = arith.constant 0 : i32
    return %c0_i32, %c0_i32_0 : i32, i32
  }
  func.func @transform_6(%arg0: i32) -> (i32, i32) {
    %c0_i32 = arith.constant 0 : i32
    %c0_i32_0 = arith.constant 0 : i32
    %c0_i32_1 = arith.constant 0 : i32
    return %c0_i32, %c0_i32_0 : i32, i32
  }
  func.func @transform_7(%arg0: i32) -> (i32, i32) {
    %c0_i32 = arith.constant 0 : i32
    %c0_i32_0 = arith.constant 0 : i32
    %c0_i32_1 = arith.constant 0 : i32
    return %c0_i32, %c0_i32_0 : i32, i32
  }
  func.func @transform_8(%arg0: i32) -> (i32, i32) {
    %c0_i32 = arith.constant 0 : i32
    %c0_i32_0 = arith.constant 0 : i32
    %c0_i32_1 = arith.constant 0 : i32
    return %c0_i32, %c0_i32_0 : i32, i32
  }
  func.func @transform_9(%arg0: i32) -> (i32, i32) {
    %c0_i32 = arith.constant 0 : i32
    %c0_i32_0 = arith.constant 0 : i32
    %c0_i32_1 = arith.constant 0 : i32
    return %c0_i32, %c0_i32_0 : i32, i32
  }
  func.func @transform_10(%arg0: i32) -> (i32, i32) {
    %c0_i32 = arith.constant 0 : i32
    %c0_i32_0 = arith.constant 0 : i32
    %c0_i32_1 = arith.constant 0 : i32
    return %c0_i32, %c0_i32_0 : i32, i32
  }
  func.func @transform_11(%arg0: i32) -> (i32, i32) {
    %c0_i32 = arith.constant 0 : i32
    %c0_i32_0 = arith.constant 0 : i32
    %c0_i32_1 = arith.constant 0 : i32
    return %c0_i32, %c0_i32_0 : i32, i32
  }
  func.func @transform_12(%arg0: i32) -> (i32, i32) {
    %c0_i32 = arith.constant 0 : i32
    %c0_i32_0 = arith.constant 0 : i32
    %c0_i32_1 = arith.constant 0 : i32
    return %c0_i32, %c0_i32_0 : i32, i32
  }
  func.func @transform_13(%arg0: i32) -> (i32, i32) {
    %c0_i32 = arith.constant 0 : i32
    %c0_i32_0 = arith.constant 0 : i32
    %c0_i32_1 = arith.constant 0 : i32
    return %c0_i32, %c0_i32_0 : i32, i32
  }
  func.func @transform_14(%arg0: i32) -> (i32, i32) {
    %c0_i32 = arith.constant 0 : i32
    %c0_i32_0 = arith.constant 0 : i32
    %c0_i32_1 = arith.constant 0 : i32
    return %c0_i32, %c0_i32_0 : i32, i32
  }
  func.func @transform_15(%arg0: i32) -> (i32, i32) {
    %c0_i32 = arith.constant 0 : i32
    %c0_i32_0 = arith.constant 0 : i32
    return %arg0, %c0_i32 : i32, i32
  }
}

</mosaic_0001>

<bundles_post_ra>
// kernel: tpu_custom_call.1
= control target key start
LH: loop header
LB: loop body
LE: loop exit
PB: predicated region body
PF: predicated region fallthrough
CT: control target
= control target key end

     0   :  { %20 = vsyncpa [#allocation3], 0  ;;  %s1252_s0 = inlined_call_operand.vmem [shape: f32[16,64], index: 0, kind: input, shape index: {}]   ;;  %s1253_s1 = inlined_call_operand.vmem [shape: f32[16,32], index: 1, kind: input, shape index: {}]   ;;  %s1254_s2 = inlined_call_operand.vmem [shape: bf16[64,32], index: 2, kind: input, shape index: {}]   ;;  %s1255_s3 = inlined_call_operand.vmem [shape: f32[1,32], index: 3, kind: input, shape index: {}]   ;;  %s1256_s4 = inlined_call_operand.vmem [shape: bf16[32,32], index: 4, kind: input, shape index: {}]   ;;  %s1257_s5 = inlined_call_operand.hbm [shape: f32[1,32], index: 5, kind: input, shape index: {}]   ;;  %s1258_s6 = inlined_call_operand.vmem [shape: bf16[32,32], index: 6, kind: input, shape index: {}]   ;;  %s1259_s7 = inlined_call_operand.hbm [shape: f32[1,32], index: 7, kind: input, shape index: {}]   ;;  %s1260_s8 = inlined_call_operand.hbm [shape: bf16[32,32], index: 8, kind: input, shape index: {}]   ;;  %s1261_s9 = inlined_call_operand.hbm [shape: f32[1,32], index: 9, kind: input, shape index: {}]   ;;  %s1262_s10 = inlined_call_operand.vmem [shape: bf16[32,32], index: 10, kind: input, shape index: {}]   ;;  %s1263_s11 = inlined_call_operand.hbm [shape: bf16[32,32], index: 11, kind: input, shape index: {}]   ;;  %s1264_s12 = inlined_call_operand.hbm [shape: f32[1,32], index: 12, kind: input, shape index: {}]   ;;  %s1265_s13 = inlined_call_operand.vmem [shape: bf16[32,128], index: 13, kind: input, shape index: {}]   ;;  %s1266_s14 = inlined_call_operand.vmem [shape: f32[1,128], index: 14, kind: input, shape index: {}]   ;;  %s1267_s15 = inlined_call_operand.hbm [shape: bf16[16,128], index: 15, kind: output, shape index: {}]  }
   0x1   :  { %21 = vsyncpa [#allocation6], 0 }
   0x2   :  { %22 = vsyncpa [#allocation9], 0 }
   0x3   :  { %23 = vsyncpa [#allocation12], 0 }
   0x4   :  { %24 = vsyncpa [#allocation4], 0  ;;  %s971_s18 = smov [#allocation5]   ;;  %s972_s20 = smov [#allocation8]  }
   0x5   :  { %s53_s19 = sshll.u32 %s971_s18, 4  ;;  %s75_s21 = sshll.u32 %s972_s20, 4  ;;  %s54_s19 = int_to_ptr.vmem [resolvable:$true] %s53_s19  ;;  %s76_s21 = int_to_ptr.vmem [resolvable:$true] %s75_s21 }
   0x6   :  { %s807_s24 = scalar_lea.hbm %s1259_s7, 16 }
   0x7   :  { %p808_p0 = scmp.ne.s32.totalorder %s1259_s7, %s807_s24  ;;  %p811_p1 = scmp.lt.u32.totalorder %s807_s24, %s1259_s7 }
   0x9   :  { %p813_p2 = pnand %p811_p1, %p808_p0 }
   0xb   :  { %816 = shalt.err (!%p813_p2)
}
   0xc   :  { %s817_s29 = scalar_lea.vmem %s54_s19, 16  ;;  %s821_s30 = scalar_lea.vmem %s54_s19, 32 }
   0xd   :  { %p818_p3 = scmp.ne.s32.totalorder %s54_s19, %s817_s29  ;;  %p822_p4 = scmp.lt.s32.totalorder %s54_s19, %s54_s19 }
   0xe   :  { %p823_p5 = scmp.lt.s32.totalorder %s821_s30, %s817_s29 }
  0x10   :  { %p824_p6 = por %p823_p5, %p822_p4 }
  0x12   :  { %p825_p7 = pnand %p824_p6, %p818_p3 }
  0x14   :  { %828 = shalt.err (!%p825_p7)
}
  0x15   :  { %56 = dma.hbm_to_vmem [thread:$0]  %s1259_s7, 16, %s54_s19, [#allocation6]  }
  0x16   :  { %s829_s22 = scalar_lea.hbm %s1261_s9, 16 }
  0x17   :  { %p830_p8 = scmp.ne.s32.totalorder %s1261_s9, %s829_s22  ;;  %p833_p9 = scmp.lt.u32.totalorder %s829_s22, %s1261_s9 }
  0x19   :  { %p835_p10 = pnand %p833_p9, %p830_p8 }
  0x1b   :  { %838 = shalt.err (!%p835_p10)
}
  0x1c   :  { %s839_s27 = scalar_lea.vmem %s76_s21, 16  ;;  %s843_s28 = scalar_lea.vmem %s76_s21, 32 }
  0x1d   :  { %p840_p11 = scmp.ne.s32.totalorder %s76_s21, %s839_s27  ;;  %p844_p12 = scmp.lt.s32.totalorder %s76_s21, %s76_s21 }
  0x1e   :  { %p845_p13 = scmp.lt.s32.totalorder %s843_s28, %s839_s27 }
  0x20   :  { %p846_p0 = por %p845_p13, %p844_p12 }
  0x22   :  { %p847_p1 = pnand %p846_p0, %p840_p11 }
  0x24   :  { %850 = shalt.err (!%p847_p1)
}
  0x25   :  { %78 = dma.hbm_to_vmem [thread:$0]  %s1261_s9, 16, %s76_s21, [#allocation9]  }
  0x26   :  { %s973_s29 = smov [#allocation2]   ;;  %s974_s16 = smov [#allocation7]  }
  0x27   :  { %s41_s30 = sshll.u32 %s973_s29, 4  ;;  %s62_s17 = sshll.u32 %s974_s16, 4  ;;  %s42_s30 = int_to_ptr.vmem [resolvable:$true] %s41_s30  ;;  %s1086_s17 = int_to_ptr.vmem [resolvable:$true] %s62_s17 }
  0x28   :  { %s851_s22 = scalar_lea.hbm %s1257_s5, 16 }
  0x29   :  { %p852_p2 = scmp.ne.s32.totalorder %s1257_s5, %s851_s22  ;;  %p855_p3 = scmp.lt.u32.totalorder %s851_s22, %s1257_s5 }
  0x2b   :  { %p857_p4 = pnand %p855_p3, %p852_p2 }
  0x2d   :  { %860 = shalt.err (!%p857_p4)
}
  0x2e   :  { %s861_s9 = scalar_lea.vmem %s42_s30, 16  ;;  %s865_s21 = scalar_lea.vmem %s42_s30, 32 }
  0x2f   :  { %p862_p5 = scmp.ne.s32.totalorder %s42_s30, %s861_s9  ;;  %p866_p6 = scmp.lt.s32.totalorder %s42_s30, %s42_s30 }
  0x30   :  { %p867_p7 = scmp.lt.s32.totalorder %s865_s21, %s861_s9 }
  0x32   :  { %p868_p8 = por %p867_p7, %p866_p6 }
  0x34   :  { %p869_p9 = pnand %p868_p8, %p862_p5 }
  0x36   :  { %872 = shalt.err (!%p869_p9)
}
  0x37   :  { %44 = dma.hbm_to_vmem [thread:$0]  %s1257_s5, 16, %s42_s30, [#allocation3]  }
  0x38   :  { %s873_s29 = scalar_lea.hbm %s1260_s8, 256 }
  0x39   :  { %p874_p10 = scmp.ne.s32.totalorder %s1260_s8, %s873_s29  ;;  %p877_p11 = scmp.lt.u32.totalorder %s873_s29, %s1260_s8 }
  0x3b   :  { %p879_p12 = pnand %p877_p11, %p874_p10 }
  0x3d   :  { %882 = shalt.err (!%p879_p12)
}
  0x3e   :  { %s883_s23 = scalar_lea.vmem %s1086_s17, 256  ;;  %p888_p0 = scmp.lt.s32.totalorder %s1086_s17, %s1086_s17 }
  0x3f   :  { %p884_p13 = scmp.ne.s32.totalorder %s1086_s17, %s883_s23  ;;  %p889_p1 = scmp.lt.s32.totalorder %s883_s23, %s883_s23 }
  0x41   :  { %p890_p2 = por %p889_p1, %p888_p0 }
  0x43   :  { %p891_p3 = pnand %p890_p2, %p884_p13 }
  0x45   :  { %894 = shalt.err (!%p891_p3)
}
  0x46   :  { %s975_s5 = smov 64   ;;  %s976_s30 = smov 4  }
  0x47   :  { %68 = dma.hbm_to_vmem [thread:$0]  %s1260_s8, 256, %s1086_s17, [#allocation6], %s975_s5, %s975_s5, %s976_s30  }
  0x48   :  { %s977_s26 = smov [#allocation10]   ;;  %s978_s21 = smov [#allocation11]  }
  0x49   :  { %s86_s9 = sshll.u32 %s977_s26, 4  ;;  %s99_s27 = sshll.u32 %s978_s21, 4  ;;  %s87_s9 = int_to_ptr.vmem [resolvable:$true] %s86_s9  ;;  %s100_s27 = int_to_ptr.vmem [resolvable:$true] %s99_s27 }
  0x4a   :  { %s895_s19 = scalar_lea.hbm %s1263_s11, 256 }
  0x4b   :  { %p896_p4 = scmp.ne.s32.totalorder %s1263_s11, %s895_s19  ;;  %p899_p5 = scmp.lt.u32.totalorder %s895_s19, %s1263_s11 }
  0x4d   :  { %p901_p6 = pnand %p899_p5, %p896_p4 }
  0x4f   :  { %904 = shalt.err (!%p901_p6)
}
  0x50   :  { %s905_s8 = scalar_lea.vmem %s87_s9, 256  ;;  %p910_p8 = scmp.lt.s32.totalorder %s87_s9, %s87_s9 }
  0x51   :  { %p906_p7 = scmp.ne.s32.totalorder %s87_s9, %s905_s8  ;;  %p911_p9 = scmp.lt.s32.totalorder %s905_s8, %s905_s8 }
  0x53   :  { %p912_p10 = por %p911_p9, %p910_p8 }
  0x55   :  { %p913_p11 = pnand %p912_p10, %p906_p7 }
  0x57   :  { %916 = shalt.err (!%p913_p11)
}
  0x58   :  { %92 = dma.hbm_to_vmem [thread:$0]  %s1263_s11, 256, %s87_s9, [#allocation9], %s975_s5, %s975_s5, %s976_s30  }
  0x59   :  { %s917_s25 = scalar_lea.hbm %s1264_s12, 16 }
  0x5a   :  { %p918_p12 = scmp.ne.s32.totalorder %s1264_s12, %s917_s25  ;;  %p921_p13 = scmp.lt.u32.totalorder %s917_s25, %s1264_s12 }
  0x5c   :  { %p923_p0 = pnand %p921_p13, %p918_p12 }
  0x5e   :  { %926 = shalt.err (!%p923_p0)
}
  0x5f   :  { %s927_s19 = scalar_lea.vmem %s100_s27, 16  ;;  %s931_s29 = scalar_lea.vmem %s100_s27, 32 }
  0x60   :  { %p928_p1 = scmp.ne.s32.totalorder %s100_s27, %s927_s19  ;;  %p932_p2 = scmp.lt.s32.totalorder %s100_s27, %s100_s27 }
  0x61   :  { %p933_p3 = scmp.lt.s32.totalorder %s931_s29, %s927_s19 }
  0x63   :  { %p934_p4 = por %p933_p3, %p932_p2 }
  0x65   :  { %p935_p5 = pnand %p934_p4, %p928_p1 }
  0x67   :  { %938 = shalt.err (!%p935_p5)
}
  0x68   :  { %102 = dma.hbm_to_vmem [thread:$0]  %s1264_s12, 16, %s100_s27, [#allocation12]  }
  0x69   :  { %961 = dma.done.wait [#allocation3], 16  }
  0x6a   :  { %962 = vsyncadd [#allocation3], 4294967280 }
  0x6b   :  { %963 = dma.done.wait [#allocation6], 272  }
  0x6c   :  { %964 = vsyncadd [#allocation6], 4294967024 }
  0x6d   :  { %965 = dma.done.wait [#allocation9], 272  }
  0x6e   :  { %966 = vsyncadd [#allocation9], 4294967024 }
  0x6f   :  { %967 = dma.done.wait [#allocation12], 16  }
  0x70   :  { %968 = vsyncadd [#allocation12], 4294967280  ;;  %v979_v0 = vmov 0.0   ;;  %vm980_vm0 = vmmov 0   ;;  %v791_v1 = vld [vmem:[%s1254_s2] sm:$0xff]   ;;  %v792_v2 = vld [vmem:[%s1254_s2 + $0x8] sm:$0xff]  }
  0x71   :  { %720 = vmatprep.subr.bf16.mxu0 %v979_v0  ;;  %728 = vmatprep.mubr.msk.bf16.mxu0 %vm980_vm0, %v979_v0  ;;  %v793_v3 = vld [vmem:[%s1254_s2 + $0x10] sm:$0xff]   ;;  %v794_v4 = vld [vmem:[%s1254_s2 + $0x18] sm:$0xff]   ;;  %v126_v5 = vld [vmem:[%s1252_s0] sm:$0xff]  ;;  %vm171_vm1 = vcmask 523264   ;;  %vm242_vm2 = vcmask 261120  }
  0x72   :  { %732 = vmatprep.subr.bf16.mxu1 %v979_v0  ;;  %736 = vmatprep.mubr.msk.bf16.mxu1 %vm980_vm0, %v979_v0  ;;  %v127_v6 = vld [vmem:[%s1252_s0 + $0x8] sm:$0xff]  ;;  %v795_v8 = vld [vmem:[%s1256_s4] sm:$0xff]   ;;  %v803_v49 = vld [vmem:[#allocation10] sm:$0xff]  }
  0x73   :  { %721 = vmatpush3.bf16.msra.mxu0 %v791_v1  ;;  %v128_v7 = vpack.c.bf16 %v127_v6, %v126_v5  ;;  %733 = vmatpush3.bf16.msra.mxu1 %v795_v8  ;;  %v796_v9 = vld [vmem:[%s1256_s4 + $0x8] sm:$0xff]   ;;  %v659_v10 = vld [vmem:[%s1255_s3] ss:$0 sm:$0xff]  ;;  %v669_v36 = vld [vmem:[#allocation5] ss:$0 sm:$0xff] }
  0x74   :  { %722 = vmatprep.subr.bf16.mxu0 %v979_v0  ;;  %734 = vmatprep.subr.bf16.mxu1 %v979_v0  ;;  %v797_v19 = vld [vmem:[%s1258_s6] sm:$0xff]   ;;  %v798_v21 = vld [vmem:[%s1258_s6 + $0x8] sm:$0xff]   ;;  %v673_v51 = vld [vmem:[#allocation8] ss:$0 sm:$0xff] }
  0x75   :  { %v129_v22 = vld [vmem:[%s1253_s1] sm:$0xff]  ;;  %v130_v23 = vld [vmem:[%s1253_s1 + $0x8] sm:$0xff] }
  0x76   :  { %v131_v24 = vpack.c.bf16 %v130_v23, %v129_v22  ;;  %v799_v25 = vld [vmem:[#allocation7] sm:$0xff]   ;;  %v800_v26 = vld [vmem:[#allocation7 + $0x8] sm:$0xff]   ;;  %v665_v27 = vld [vmem:[#allocation2] ss:$0 sm:$0xff] }
  0x77   :  { %723 = vmatpush3.bf16.msra.mxu0 %v792_v2  ;;  %735 = vmatpush3.bf16.msra.mxu1 %v796_v9  ;;  %v801_v46 = vld [vmem:[%s1262_s10] sm:$0xff]   ;;  %v802_v48 = vld [vmem:[%s1262_s10 + $0x8] sm:$0xff]  }
  0x78   :  { %724 = vmatprep.subr.bf16.mxu0 %v979_v0  ;;  %740 = vmatprep.subr.bf16.mxu1 %v979_v0  ;;  %v804_v50 = vld [vmem:[#allocation10 + $0x8] sm:$0xff]   ;;  %v683_v5 = vld [vmem:[#allocation11] ss:$0 sm:$0xff] }
  0x79   :  { %v805_v2 = vld [vmem:[%s1265_s13] sm:$0xff]  }
  0x7b   :  { %725 = vmatpush3.bf16.msra.mxu0 %v793_v3  ;;  %v806_v3 = vld [vmem:[%s1265_s13 + $0x8] sm:$0xff]   ;;  %s981_s13 = smov [#allocation13]  }
  0x7c   :  { %726 = vmatprep.subr.bf16.mxu0 %v979_v0  ;;  %s644_s25 = sshll.u32 %s981_s13, 4  ;;  %s645_s25 = int_to_ptr.vmem [resolvable:$true] %s644_s25 }
  0x7d   :  { %s939_s26 = scalar_lea.vmem %s645_s25, 128  ;;  %p944_p7 = scmp.lt.s32.totalorder %s645_s25, %s645_s25 }
  0x7e   :  { %p940_p6 = scmp.ne.s32.totalorder %s645_s25, %s939_s26  ;;  %p945_p8 = scmp.lt.s32.totalorder %s939_s26, %s939_s26 }
  0x7f   :  { %727 = vmatpush3.bf16.msra.mxu0 %v794_v4 }
  0x80   :  { %748 = vmatprep.subr.bf16.mxu0 %v979_v0  ;;  %p946_p9 = por %p945_p8, %p944_p7 }
  0x82   :  { %729 = vmatmul.mubr.msk.bf16.vlgmr.msra.gmra.mrb[0].mxu0 %vm171_vm1, %v128_v7  ;;  %p947_p10 = pnand %p946_p9, %p940_p6 }
  0x83   :  { %752 = vmatprep.mubr.msk.bf16.mxu0 %vm980_vm0, %v979_v0  ;;  %749 = vmatpush3.bf16.msra.mxu0 %v799_v25 }
  0x84   :  { %750 = vmatprep.subr.bf16.mxu0 %v979_v0 }
  0x87   :  { %751 = vmatpush3.bf16.msra.mxu0 %v800_v26 }
  0x88   :  { %764 = vmatprep.subr.bf16.mxu0 %v979_v0 }
 0x155   :  { %v209_v11 = vpop.f32.mrb[0].mxu0 }
 0x156   :  { %v210_v12 = vadd.f32 %v659_v10, %v209_v11  ;;  %v730_v13 = vpop.f32.mrb[1].mxu0 }
 0x157   :  { %v212_v14 = vpop.f32.mrb[2].mxu0 }
 0x158   :  { %v213_v15 = vadd.f32 %v659_v10, %v212_v14  ;;  %v731_v16 = vpop.f32.mrb[3].mxu0  ;;  %v216_v17 = vmax.f32 %v210_v12, 0.0 }
 0x15a   :  { %v217_v18 = vmax.f32 %v213_v15, 0.0 }
 0x15c   :  { %v218_v20 = vpack.c.bf16 %v217_v18, %v216_v17 }
 0x15e   :  { %737 = vmatmul.mubr.msk.bf16.vlgmr.msra.gmra.mrb[0].mxu1 %vm242_vm2, %v218_v20 }
 0x15f   :  { %741 = vmatpush3.bf16.msra.mxu1 %v797_v19  ;;  %744 = vmatprep.mubr.msk.bf16.mxu1 %vm980_vm0, %v979_v0 }
 0x160   :  { %742 = vmatprep.subr.bf16.mxu1 %v979_v0 }
 0x163   :  { %743 = vmatpush3.bf16.msra.mxu1 %v798_v21 }
 0x164   :  { %756 = vmatprep.subr.bf16.mxu1 %v979_v0 }
 0x166   :  { %745 = vmatmul.mubr.msk.bf16.vlgmr.msra.gmra.mrb[4].mxu1 %vm242_vm2, %v131_v24 }
 0x167   :  { %760 = vmatprep.mubr.msk.bf16.mxu1 %vm980_vm0, %v979_v0  ;;  %757 = vmatpush3.bf16.msra.mxu1 %v803_v49 }
 0x168   :  { %758 = vmatprep.subr.bf16.mxu1 %v979_v0 }
 0x16b   :  { %759 = vmatpush3.bf16.msra.mxu1 %v804_v50 }
 0x16c   :  { %772 = vmatprep.subr.bf16.mxu1 %v979_v0 }
 0x231   :  { %v280_v28 = vpop.f32.mrb[0].mxu1 }
 0x232   :  { %v281_v29 = vadd.f32 %v665_v27, %v280_v28  ;;  %v738_v30 = vpop.f32.mrb[1].mxu1 }
 0x233   :  { %v283_v31 = vpop.f32.mrb[2].mxu1 }
 0x234   :  { %v284_v32 = vadd.f32 %v665_v27, %v283_v31  ;;  %v739_v33 = vpop.f32.mrb[3].mxu1  ;;  %v287_v34 = vmax.f32 %v281_v29, 0.0 }
 0x236   :  { %v288_v35 = vmax.f32 %v284_v32, 0.0 }
 0x238   :  { %v428_v37 = vpack.c.bf16 %v288_v35, %v287_v34 }
 0x239   :  { %v349_v38 = vpop.f32.mrb[4].mxu1 }
 0x23a   :  { %v350_v39 = vadd.f32 %v669_v36, %v349_v38  ;;  %v746_v40 = vpop.f32.mrb[5].mxu1 }
 0x23b   :  { %v352_v41 = vpop.f32.mrb[6].mxu1 }
 0x23c   :  { %v353_v42 = vadd.f32 %v669_v36, %v352_v41  ;;  %v747_v43 = vpop.f32.mrb[7].mxu1  ;;  %v356_v44 = vmax.f32 %v350_v39, 0.0 }
 0x23e   :  { %v357_v45 = vmax.f32 %v353_v42, 0.0 }
 0x240   :  { %v358_v47 = vpack.c.bf16 %v357_v45, %v356_v44 }
 0x242   :  { %753 = vmatmul.mubr.msk.bf16.vlgmr.msra.gmra.mrb[4].mxu0 %vm242_vm2, %v358_v47 }
 0x243   :  { %765 = vmatpush3.bf16.msra.mxu0 %v801_v46  ;;  %768 = vmatprep.mubr.msk.bf16.mxu0 %vm980_vm0, %v979_v0 }
 0x244   :  { %766 = vmatprep.subr.bf16.mxu0 %v979_v0 }
 0x247   :  { %767 = vmatpush3.bf16.msra.mxu0 %v802_v48 }
 0x24a   :  { %769 = vmatmul.mubr.msk.bf16.vlgmr.msra.gmra.mrb[8].mxu0 %vm242_vm2, %v428_v37 }
 0x315   :  { %v419_v52 = vpop.f32.mrb[4].mxu0 }
 0x316   :  { %v420_v53 = vadd.f32 %v673_v51, %v419_v52  ;;  %v754_v54 = vpop.f32.mrb[5].mxu0 }
 0x317   :  { %v422_v55 = vpop.f32.mrb[6].mxu0 }
 0x318   :  { %v423_v56 = vadd.f32 %v673_v51, %v422_v55  ;;  %v755_v57 = vpop.f32.mrb[7].mxu0  ;;  %v426_v58 = vmax.f32 %v420_v53, 0.0 }
 0x31a   :  { %v427_v59 = vmax.f32 %v423_v56, 0.0 }
 0x31c   :  { %v433_v60 = vpack.c.bf16 %v427_v59, %v426_v58 }
 0x31d   :  { %v543_v61 = vpop.f32.mrb[8].mxu0 }
 0x31e   :  { %761 = vmatmul.mubr.msk.bf16.vlgmr.msra.gmra.mrb[8].mxu1 %vm242_vm2, %v433_v60  ;;  %v770_v62 = vpop.f32.mrb[9].mxu0 }
 0x31f   :  { %v546_v63 = vpop.f32.mrb[10].mxu0  ;;  %776 = vmatprep.mubr.msk.bf16.mxu1 %vm980_vm0, %v979_v0  ;;  %773 = vmatpush3.bf16.msra.mxu1 %v805_v2 }
 0x320   :  { %v771_v1 = vpop.f32.mrb[11].mxu0  ;;  %774 = vmatprep.subr.bf16.mxu1 %v979_v0  ;;  %v684_v0 = vld [vmem:[%s1266_s14] ss:$0 sm:$0xff] }
 0x323   :  { %775 = vmatpush3.bf16.msra.mxu1 %v806_v3 }
 0x3f1   :  { %v487_v4 = vpop.f32.mrb[8].mxu1 }
 0x3f2   :  { %v544_v6 = vadd.f32 %v543_v61, %v487_v4  ;;  %v762_v7 = vpop.f32.mrb[9].mxu1 }
 0x3f3   :  { %v490_v8 = vpop.f32.mrb[10].mxu1 }
 0x3f4   :  { %v557_v9 = vadd.f32 %v683_v5, %v544_v6  ;;  %v547_v10 = vadd.f32 %v546_v63, %v490_v8  ;;  %v763_v11 = vpop.f32.mrb[11].mxu1 }
 0x3f6   :  { %v558_v12 = vadd.f32 %v683_v5, %v547_v10  ;;  %v559_v13 = vmax.f32 %v557_v9, 0.0 }
 0x3f8   :  { %v560_v14 = vmax.f32 %v558_v12, 0.0 }
 0x3fa   :  { %v561_v15 = vpack.c.bf16 %v560_v14, %v559_v13 }
 0x3fc   :  { %777 = vmatmul.mubr.msk.bf16.vlgmr.msra.gmra.mrb[12].mxu1 %vm242_vm2, %v561_v15 }
 0x4cf   :  { %v622_v16 = vpop.f32.mrb[12].mxu1 }
 0x4d0   :  { %v778_v17 = vpop.f32.mrb[13].mxu1  ;;  %v623_v19 = vadd.f32 %v684_v0, %v622_v16 }
 0x4d1   :  { %v625_v18 = vpop.f32.mrb[14].mxu1 }
 0x4d2   :  { %v626_v20 = vadd.f32 %v684_v0, %v625_v18  ;;  %v779_v21 = vpop.f32.mrb[15].mxu1 }
 0x4d4   :  { %v695_v22 = vpack.c.bf16 %v626_v20, %v623_v19 }
 0x4d6   :  { %696 = vst [vmem:[#allocation13] sm:$0xff] %v695_v22  }
 0x4d7   :  { %950 = shalt.err (!%p947_p10)
}
 0x4d8   :  { %s951_s21 = scalar_lea.hbm %s1267_s15, 128 }
 0x4d9   :  { %p952_p11 = scmp.ne.s32.totalorder %s1267_s15, %s951_s21  ;;  %p955_p12 = scmp.lt.u32.totalorder %s951_s21, %s1267_s15 }
 0x4db   :  { %p957_p13 = pnand %p955_p12, %p952_p11 }
 0x4dd   :  { %960 = shalt.err (!%p957_p13)
}
 0x4de   :  { %650 = dma.vmem_to_hbm [thread:$0]  %s645_s25, 128, %s1267_s15, [#allocation4], %s975_s5, %s975_s5, %s976_s30  }
 0x4df   :  { %969 = dma.done.wait [#allocation4], 128  }
 0x4e0   :  { %970 = vsyncadd [#allocation4], 4294967168 }
 0x4e1   :  { %654 = vsyncpa [#allocation3], 1 }
 0x4e2   :  { %655 = vsyncpa [#allocation6], 1 }
 0x4e3   :  { %656 = vsyncpa [#allocation9], 1 }
 0x4e4   :  { %657 = vsyncpa [#allocation12], 1 }
 0x4e5   :  { %658 = vsyncpa [#allocation4], 1 }

</bundles_post_ra>
